<compile_context>
chip_gen: v5e
topology: v5e:2x2
jax: 0.10.0
libtpu: 0.0.40
codegen_flags: <defaults>
</compile_context>

<pallas_src>
import functools

import jax
import jax.numpy as jnp
from jax.experimental import pallas as pl
from jax.experimental.pallas import tpu as pltpu

EPS = 1e-5          # nn.LayerNorm default eps
_SUBLANE = 8


def _round_up(n, m):
    return ((n + m - 1) // m) * m


def _layernorm(h, gamma, beta):
    """LayerNorm over the last axis in f32; gamma/beta are (1, d) rows (broadcast)."""
    mu = jnp.mean(h, axis=-1, keepdims=True)
    c = h - mu
    var = jnp.mean(c * c, axis=-1, keepdims=True)
    return c * jax.lax.rsqrt(var + EPS) * gamma + beta


def _make_kernel(n_layers, normalize_input, compute_dtype):
    """Fused kernel body for one batch tile (whole MLP per tile, weights VMEM-resident)."""

    def kernel(*refs):
        idx = 0
        h = refs[idx][...].astype(jnp.float32)            # (tb, d0) batch tile of x
        idx += 1

        if normalize_input:
            v = refs[idx][...]                            # (2, d0): [gamma; beta]
            idx += 1
            h = _layernorm(h, v[0:1, :], v[1:2, :])

        for li in range(n_layers):
            w = refs[idx][...]                            # (din, dout), compute_dtype
            vec = refs[idx + 1][...]                      # (3, dout)=[b;g;beta] or (1, dout)=[b]
            idx += 2
            # MXU matmul in compute_dtype with f32 accumulation; bias add in f32 (VPU).
            h = jnp.dot(h.astype(compute_dtype), w,
                        preferred_element_type=jnp.float32) + vec[0:1, :]
            if li != n_layers - 1:
                h = jnp.maximum(_layernorm(h, vec[1:2, :], vec[2:3, :]), 0.0)

        out_ref = refs[idx]
        out_ref[...] = h.astype(out_ref.dtype)

    return kernel


def _vmem_capacity_bytes():
    try:
        return int(pltpu.get_tpu_info().vmem_capacity_bytes)   # 64 MiB v7x, 128 MiB v5e/v6e
    except Exception:
        return 64 * 1024 * 1024                                # conservative fallback


def prepare_dnn_operands(params, dimensions, normalize_input=True,
                         compute_dtype=jnp.bfloat16):
    """One-time operand preparation (do this OUTSIDE the per-call path).

    Casts weights to compute_dtype and stacks per-layer (bias, gamma, beta) rows into a
    single (3, dout) f32 operand (just (1, dout) bias for the final layer).
    """
    compute_dtype = jnp.dtype(compute_dtype)
    dims = tuple(int(d) for d in dimensions)
    n_layers = len(dims) - 1
    ops = []
    if normalize_input:
        ops.append(jnp.concatenate([jnp.asarray(params["ln_in_g"], jnp.float32),
                                    jnp.asarray(params["ln_in_b"], jnp.float32)],
                                   axis=0))                        # (2, d0)
    for li in range(n_layers):
        ops.append(jnp.asarray(params[f"W{li}"], compute_dtype))   # (din, dout)
        if li != n_layers - 1:
            vec = jnp.concatenate([jnp.asarray(params[f"b{li}"], jnp.float32),
                                   jnp.asarray(params[f"g{li}"], jnp.float32),
                                   jnp.asarray(params[f"beta{li}"], jnp.float32)],
                                  axis=0)                          # (3, dout)
        else:
            vec = jnp.asarray(params[f"b{li}"], jnp.float32)       # (1, dout)
        ops.append(vec)
    return tuple(ops)


@functools.partial(
    jax.jit,
    static_argnames=("dimensions", "normalize_input", "compute_dtype_name",
                     "max_batch_tile"))
def _forward_impl(x, operands, *, dimensions, normalize_input, compute_dtype_name,
                  max_batch_tile):
    compute_dtype = jnp.dtype(compute_dtype_name)
    dims = tuple(int(d) for d in dimensions)
    n_layers = len(dims) - 1
    d0, d_out = dims[0], dims[-1]
    batch = x.shape[0]

    # ---------------- generation-aware VMEM budgeting ----------------
    vmem_cap = _vmem_capacity_bytes()
    # Grid-invariant operands are (default) double-buffered by the pipeline.
    resident_bytes = 2 * sum(int(op.size) * op.dtype.itemsize for op in operands)
    per_row_bytes = (2 * d0 * x.dtype.itemsize        # double-buffered x tile
                     + 2 * d_out * 4                  # double-buffered out tile (f32)
                     + 12 * max(dims) * 4)            # live f32/bf16 intermediates (rough)
    usable = min(int(vmem_cap * 0.75), vmem_cap - (8 << 20))
    tile_budget = max(usable - resident_bytes, per_row_bytes * _SUBLANE)

    # ---------------- batch tile / grid ----------------
    if batch <= _SUBLANE:
        tb = batch                                    # block dim == array dim (always legal)
    else:
        tb = min(int(max_batch_tile), tile_budget // per_row_bytes)
        tb = max(_SUBLANE, (tb // _SUBLANE) * _SUBLANE)
        tb = min(tb, _round_up(batch, _SUBLANE))
        if -(-batch // tb) == 1:
            # Force >= 2 grid steps so both v7x TensorCores get work and DMAs pipeline.
            tb = _round_up(-(-batch // 2), _SUBLANE)
    grid = (pl.cdiv(batch, tb),)

    # ---------------- specs ----------------
    in_specs = [pl.BlockSpec((tb, d0), lambda i: (i, 0))]        # streamed x tile
    for op in operands:                                          # VMEM-resident params
        in_specs.append(pl.BlockSpec(op.shape, lambda i: (0, 0)))

    out_shape = jax.ShapeDtypeStruct((batch, d_out), jnp.float32)   # true width, no slab
    out_spec = pl.BlockSpec((tb, d_out), lambda i: (i, 0))

    # ---------------- cost / vmem hints ----------------
    flops = 2 * batch * sum(dims[i] * dims[i + 1] for i in range(n_layers))
    transcendentals = batch * max(n_layers - 1 + int(normalize_input), 0)
    bytes_accessed = int(x.size * x.dtype.itemsize + batch * d_out * 4
                         + sum(int(op.size) * op.dtype.itemsize for op in operands))

    vmem_limit = resident_bytes + tb * per_row_bytes + (8 << 20)
    vmem_limit = int(min(max(vmem_limit, 32 << 20),
                         min(100 << 20, int(vmem_cap * 0.9))))   # ~57 MiB cap on v7x

    kernel = _make_kernel(n_layers, normalize_input, compute_dtype)

    return pl.pallas_call(
        kernel,
        grid=grid,
        in_specs=in_specs,
        out_specs=out_spec,
        out_shape=out_shape,
        compiler_params=pltpu.CompilerParams(
            dimension_semantics=("parallel",),       # batch axis -> both TCs on v7x
            vmem_limit_bytes=vmem_limit),
        cost_estimate=pl.CostEstimate(
            flops=int(flops),
            transcendentals=int(transcendentals),
            bytes_accessed=bytes_accessed),
    )(x, *operands)


def dnn_block_forward(x, operands, *, dimensions, normalize_input=True,
                      compute_dtype=jnp.bfloat16, max_batch_tile=512):
    """Fused forward pass of DNN_block (2-D LayerNorm input path).

    `operands` must come from prepare_dnn_operands() (one-time prep outside this call).
    """
    return _forward_impl(
        x, operands,
        dimensions=tuple(int(d) for d in dimensions),
        normalize_input=bool(normalize_input),
        compute_dtype_name=jnp.dtype(compute_dtype).name,
        max_batch_tile=int(max_batch_tile))


# ---------------------------------------------------------------------------
# Parameters + pure-JAX reference (mirrors the PyTorch module's 2-D forward).
# ---------------------------------------------------------------------------

def init_dnn_params(key, dimensions, normalize_input=True):
    params = {}
    n_layers = len(dimensions) - 1
    keys = jax.random.split(key, 2 * n_layers + 2)
    if normalize_input:
        d0 = dimensions[0]
        # nn.LayerNorm default init is gamma=1, beta=0; perturb slightly (deterministic)
        # so the affine part is actually exercised.
        params["ln_in_g"] = (1.0 + 0.01 * jax.random.normal(keys[0], (1, d0))).astype(jnp.float32)
        params["ln_in_b"] = (0.01 * jax.random.normal(keys[1], (1, d0))).astype(jnp.float32)
    for li, (din, dout) in enumerate(zip(dimensions[:-1], dimensions[1:])):
        bound = 1.0 / float(din) ** 0.5
        params[f"W{li}"] = jax.random.uniform(keys[2 + 2 * li], (din, dout),
                                              minval=-bound, maxval=bound, dtype=jnp.float32)
        params[f"b{li}"] = jax.random.uniform(keys[3 + 2 * li], (1, dout),
                                              minval=-bound, maxval=bound, dtype=jnp.float32)
        if li != n_layers - 1:
            params[f"g{li}"] = jnp.ones((1, dout), jnp.float32)
            params[f"beta{li}"] = jnp.zeros((1, dout), jnp.float32)
    return params


def _layernorm_ref(h, gamma, beta):
    mu = jnp.mean(h, axis=-1, keepdims=True)
    var = jnp.mean((h - mu) ** 2, axis=-1, keepdims=True)
    return (h - mu) * jax.lax.rsqrt(var + EPS) * gamma + beta


def dnn_block_reference(x, params, dimensions, normalize_input=True, matmul_dtype=None):
    """Pure-JAX reference. matmul_dtype=None -> exact f32 (PyTorch-equivalent);
    matmul_dtype=jnp.bfloat16 -> mirrors the kernel's MXU math."""
    h = x.astype(jnp.float32)
    if normalize_input:
        h = _layernorm_ref(h, params["ln_in_g"], params["ln_in_b"])
    n_layers = len(dimensions) - 1
    for li in range(n_layers):
        w = params[f"W{li}"]
        if matmul_dtype is not None:
            h = jnp.dot(h.astype(matmul_dtype), w.astype(matmul_dtype),
                        preferred_element_type=jnp.float32) + params[f"b{li}"]
        else:
            h = jnp.dot(h, w) + params[f"b{li}"]
        if li != n_layers - 1:
            h = jnp.maximum(_layernorm_ref(h, params[f"g{li}"], params[f"beta{li}"]), 0.0)
    return h


if __name__ == "__main__":
    dimensions = (32, 64, 64, 16)   # input_dim=32, two hidden layers, output=16
    normalize_input = True
    batch = 30                      # not a tile multiple -> exercises the partial last block

    key = jax.random.PRNGKey(0)
    kx, kp = jax.random.split(key)
    x = jax.random.normal(kx, (batch, dimensions[0]), dtype=jnp.float32)
    params = init_dnn_params(kp, dimensions, normalize_input)

    # One-time operand preparation (cast / stack), outside the per-call path.
    operands = prepare_dnn_operands(params, dimensions, normalize_input)

    out = dnn_block_forward(x, operands, dimensions=dimensions,
                            normalize_input=normalize_input)
    out = jax.block_until_ready(out)
    assert out.shape == (batch, dimensions[-1])
    assert bool(jnp.all(jnp.isfinite(out)))

    # Tight check against a reference mirroring the kernel's bf16-MXU / f32-LN math.
    ref_bf16 = dnn_block_reference(x, params, dimensions, normalize_input,
                                   matmul_dtype=jnp.bfloat16)
    assert jnp.allclose(out, ref_bf16, atol=5e-3, rtol=5e-3), "mismatch vs mirrored reference"

    # Loose sanity check against the exact f32 (PyTorch-equivalent) math.
    ref_f32 = dnn_block_reference(x, params, dimensions, normalize_input)
    assert jnp.allclose(out, ref_f32, atol=5e-2, rtol=5e-2), "mismatch vs f32 reference"

    print("KERNEL_OK")
</pallas_src>

<mosaic_0001>
module attributes {stable_mosaic.version = 11 : i64} {
  func.func @kernel(%arg0: i32, %arg1: memref<16x32xf32, #tpu.memory_space<vmem>>, %arg2: memref<2x32xf32, #tpu.memory_space<vmem>>, %arg3: memref<32x64xbf16, #tpu.memory_space<vmem>>, %arg4: memref<3x64xf32, #tpu.memory_space<vmem>>, %arg5: memref<64x64xbf16, #tpu.memory_space<vmem>>, %arg6: memref<3x64xf32, #tpu.memory_space<vmem>>, %arg7: memref<64x16xbf16, #tpu.memory_space<vmem>>, %arg8: memref<1x16xf32, #tpu.memory_space<vmem>>, %arg9: memref<16x16xf32, #tpu.memory_space<vmem>>) attributes {dimension_semantics = [#tpu.dimension_semantics<parallel>], iteration_bounds = array<i64: 2>, scalar_prefetch = 0 : i64, scratch_operands = 0 : i64, tpu.core_type = #tpu.core_type<tc>, window_params = [{transform_indices = @transform_0, window_bounds = array<i64: 16, 32>}, {pipeline_mode = #tpu.pipeline_mode<synchronous>, transform_indices = @transform_1, window_bounds = array<i64: 2, 32>}, {pipeline_mode = #tpu.pipeline_mode<synchronous>, transform_indices = @transform_2, window_bounds = array<i64: 32, 64>}, {pipeline_mode = #tpu.pipeline_mode<synchronous>, transform_indices = @transform_3, window_bounds = array<i64: 3, 64>}, {pipeline_mode = #tpu.pipeline_mode<synchronous>, transform_indices = @transform_4, window_bounds = array<i64: 64, 64>}, {pipeline_mode = #tpu.pipeline_mode<synchronous>, transform_indices = @transform_5, window_bounds = array<i64: 3, 64>}, {pipeline_mode = #tpu.pipeline_mode<synchronous>, transform_indices = @transform_6, window_bounds = array<i64: 64, 16>}, {pipeline_mode = #tpu.pipeline_mode<synchronous>, transform_indices = @transform_7, window_bounds = array<i64: 1, 16>}, {transform_indices = @transform_8, window_bounds = array<i64: 16, 16>}]} {
    %c0 = arith.constant 0 : index
    %c0_0 = arith.constant 0 : index
    %0 = vector.load %arg1[%c0, %c0_0] : memref<16x32xf32, #tpu.memory_space<vmem>>, vector<16x32xf32>
    %c0_1 = arith.constant 0 : index
    %c0_2 = arith.constant 0 : index
    %1 = vector.load %arg2[%c0_1, %c0_2] : memref<2x32xf32, #tpu.memory_space<vmem>>, vector<2x32xf32>
    %2 = vector.extract_strided_slice %1 {offsets = [0, 0], sizes = [1, 32], strides = [1, 1]} : vector<2x32xf32> to vector<1x32xf32>
    %3 = vector.extract_strided_slice %1 {offsets = [1, 0], sizes = [1, 32], strides = [1, 1]} : vector<2x32xf32> to vector<1x32xf32>
    %cst = arith.constant dense<0.000000e+00> : vector<16xf32>
    %4 = vector.multi_reduction <add>, %0, %cst [1] : vector<16x32xf32> to vector<16xf32>
    %5 = vector.shape_cast %4 : vector<16xf32> to vector<16x1xf32>
    %cst_3 = arith.constant 3.200000e+01 : f32
    %6 = vector.broadcast %cst_3 : f32 to vector<16x1xf32>
    %7 = arith.divf %5, %6 : vector<16x1xf32>
    %8 = vector.broadcast %7 : vector<16x1xf32> to vector<16x32xf32>
    %9 = arith.subf %0, %8 : vector<16x32xf32>
    %10 = arith.mulf %9, %9 : vector<16x32xf32>
    %cst_4 = arith.constant dense<0.000000e+00> : vector<16xf32>
    %11 = vector.multi_reduction <add>, %10, %cst_4 [1] : vector<16x32xf32> to vector<16xf32>
    %12 = vector.shape_cast %11 : vector<16xf32> to vector<16x1xf32>
    %cst_5 = arith.constant 3.200000e+01 : f32
    %13 = vector.broadcast %cst_5 : f32 to vector<16x1xf32>
    %14 = arith.divf %12, %13 : vector<16x1xf32>
    %cst_6 = arith.constant 9.99999974E-6 : f32
    %15 = vector.broadcast %cst_6 : f32 to vector<16x1xf32>
    %16 = arith.addf %14, %15 : vector<16x1xf32>
    %17 = math.rsqrt %16 : vector<16x1xf32>
    %18 = vector.broadcast %17 : vector<16x1xf32> to vector<16x32xf32>
    %19 = arith.mulf %9, %18 : vector<16x32xf32>
    %20 = vector.broadcast %2 : vector<1x32xf32> to vector<16x32xf32>
    %21 = arith.mulf %19, %20 : vector<16x32xf32>
    %22 = vector.broadcast %3 : vector<1x32xf32> to vector<16x32xf32>
    %23 = arith.addf %21, %22 : vector<16x32xf32>
    %c0_7 = arith.constant 0 : index
    %c0_8 = arith.constant 0 : index
    %24 = vector.load %arg3[%c0_7, %c0_8] : memref<32x64xbf16, #tpu.memory_space<vmem>>, vector<32x64xbf16>
    %c0_9 = arith.constant 0 : index
    %c0_10 = arith.constant 0 : index
    %25 = vector.load %arg4[%c0_9, %c0_10] : memref<3x64xf32, #tpu.memory_space<vmem>>, vector<3x64xf32>
    %26 = arith.truncf %23 : vector<16x32xf32> to vector<16x32xbf16>
    %cst_11 = arith.constant dense<0.000000e+00> : vector<16x64xf32>
    %27 = tpu.matmul %26, %24, %cst_11 {dimension_numbers = #tpu.dot_dimension_numbers<[1], [0], [0], [1], [0, 0, 1, 1], [], []>} : vector<16x32xbf16>, vector<32x64xbf16>, vector<16x64xf32> -> vector<16x64xf32>
    %28 = vector.extract_strided_slice %25 {offsets = [0, 0], sizes = [1, 64], strides = [1, 1]} : vector<3x64xf32> to vector<1x64xf32>
    %29 = vector.broadcast %28 : vector<1x64xf32> to vector<16x64xf32>
    %30 = arith.addf %27, %29 : vector<16x64xf32>
    %31 = vector.extract_strided_slice %25 {offsets = [1, 0], sizes = [1, 64], strides = [1, 1]} : vector<3x64xf32> to vector<1x64xf32>
    %32 = vector.extract_strided_slice %25 {offsets = [2, 0], sizes = [1, 64], strides = [1, 1]} : vector<3x64xf32> to vector<1x64xf32>
    %cst_12 = arith.constant dense<0.000000e+00> : vector<16xf32>
    %33 = vector.multi_reduction <add>, %30, %cst_12 [1] : vector<16x64xf32> to vector<16xf32>
    %34 = vector.shape_cast %33 : vector<16xf32> to vector<16x1xf32>
    %cst_13 = arith.constant 6.400000e+01 : f32
    %35 = vector.broadcast %cst_13 : f32 to vector<16x1xf32>
    %36 = arith.divf %34, %35 : vector<16x1xf32>
    %37 = vector.broadcast %36 : vector<16x1xf32> to vector<16x64xf32>
    %38 = arith.subf %30, %37 : vector<16x64xf32>
    %39 = arith.mulf %38, %38 : vector<16x64xf32>
    %cst_14 = arith.constant dense<0.000000e+00> : vector<16xf32>
    %40 = vector.multi_reduction <add>, %39, %cst_14 [1] : vector<16x64xf32> to vector<16xf32>
    %41 = vector.shape_cast %40 : vector<16xf32> to vector<16x1xf32>
    %cst_15 = arith.constant 6.400000e+01 : f32
    %42 = vector.broadcast %cst_15 : f32 to vector<16x1xf32>
    %43 = arith.divf %41, %42 : vector<16x1xf32>
    %cst_16 = arith.constant 9.99999974E-6 : f32
    %44 = vector.broadcast %cst_16 : f32 to vector<16x1xf32>
    %45 = arith.addf %43, %44 : vector<16x1xf32>
    %46 = math.rsqrt %45 : vector<16x1xf32>
    %47 = vector.broadcast %46 : vector<16x1xf32> to vector<16x64xf32>
    %48 = arith.mulf %38, %47 : vector<16x64xf32>
    %49 = vector.broadcast %31 : vector<1x64xf32> to vector<16x64xf32>
    %50 = arith.mulf %48, %49 : vector<16x64xf32>
    %51 = vector.broadcast %32 : vector<1x64xf32> to vector<16x64xf32>
    %52 = arith.addf %50, %51 : vector<16x64xf32>
    %cst_17 = arith.constant 0.000000e+00 : f32
    %53 = vector.broadcast %cst_17 : f32 to vector<16x64xf32>
    %54 = arith.maximumf %52, %53 : vector<16x64xf32>
    %c0_18 = arith.constant 0 : index
    %c0_19 = arith.constant 0 : index
    %55 = vector.load %arg5[%c0_18, %c0_19] : memref<64x64xbf16, #tpu.memory_space<vmem>>, vector<64x64xbf16>
    %c0_20 = arith.constant 0 : index
    %c0_21 = arith.constant 0 : index
    %56 = vector.load %arg6[%c0_20, %c0_21] : memref<3x64xf32, #tpu.memory_space<vmem>>, vector<3x64xf32>
    %57 = arith.truncf %54 : vector<16x64xf32> to vector<16x64xbf16>
    %cst_22 = arith.constant dense<0.000000e+00> : vector<16x64xf32>
    %58 = tpu.matmul %57, %55, %cst_22 {dimension_numbers = #tpu.dot_dimension_numbers<[1], [0], [0], [1], [0, 0, 1, 1], [], []>} : vector<16x64xbf16>, vector<64x64xbf16>, vector<16x64xf32> -> vector<16x64xf32>
    %59 = vector.extract_strided_slice %56 {offsets = [0, 0], sizes = [1, 64], strides = [1, 1]} : vector<3x64xf32> to vector<1x64xf32>
    %60 = vector.broadcast %59 : vector<1x64xf32> to vector<16x64xf32>
    %61 = arith.addf %58, %60 : vector<16x64xf32>
    %62 = vector.extract_strided_slice %56 {offsets = [1, 0], sizes = [1, 64], strides = [1, 1]} : vector<3x64xf32> to vector<1x64xf32>
    %63 = vector.extract_strided_slice %56 {offsets = [2, 0], sizes = [1, 64], strides = [1, 1]} : vector<3x64xf32> to vector<1x64xf32>
    %cst_23 = arith.constant dense<0.000000e+00> : vector<16xf32>
    %64 = vector.multi_reduction <add>, %61, %cst_23 [1] : vector<16x64xf32> to vector<16xf32>
    %65 = vector.shape_cast %64 : vector<16xf32> to vector<16x1xf32>
    %cst_24 = arith.constant 6.400000e+01 : f32
    %66 = vector.broadcast %cst_24 : f32 to vector<16x1xf32>
    %67 = arith.divf %65, %66 : vector<16x1xf32>
    %68 = vector.broadcast %67 : vector<16x1xf32> to vector<16x64xf32>
    %69 = arith.subf %61, %68 : vector<16x64xf32>
    %70 = arith.mulf %69, %69 : vector<16x64xf32>
    %cst_25 = arith.constant dense<0.000000e+00> : vector<16xf32>
    %71 = vector.multi_reduction <add>, %70, %cst_25 [1] : vector<16x64xf32> to vector<16xf32>
    %72 = vector.shape_cast %71 : vector<16xf32> to vector<16x1xf32>
    %cst_26 = arith.constant 6.400000e+01 : f32
    %73 = vector.broadcast %cst_26 : f32 to vector<16x1xf32>
    %74 = arith.divf %72, %73 : vector<16x1xf32>
    %cst_27 = arith.constant 9.99999974E-6 : f32
    %75 = vector.broadcast %cst_27 : f32 to vector<16x1xf32>
    %76 = arith.addf %74, %75 : vector<16x1xf32>
    %77 = math.rsqrt %76 : vector<16x1xf32>
    %78 = vector.broadcast %77 : vector<16x1xf32> to vector<16x64xf32>
    %79 = arith.mulf %69, %78 : vector<16x64xf32>
    %80 = vector.broadcast %62 : vector<1x64xf32> to vector<16x64xf32>
    %81 = arith.mulf %79, %80 : vector<16x64xf32>
    %82 = vector.broadcast %63 : vector<1x64xf32> to vector<16x64xf32>
    %83 = arith.addf %81, %82 : vector<16x64xf32>
    %cst_28 = arith.constant 0.000000e+00 : f32
    %84 = vector.broadcast %cst_28 : f32 to vector<16x64xf32>
    %85 = arith.maximumf %83, %84 : vector<16x64xf32>
    %c0_29 = arith.constant 0 : index
    %c0_30 = arith.constant 0 : index
    %86 = vector.load %arg7[%c0_29, %c0_30] : memref<64x16xbf16, #tpu.memory_space<vmem>>, vector<64x16xbf16>
    %c0_31 = arith.constant 0 : index
    %c0_32 = arith.constant 0 : index
    %87 = vector.load %arg8[%c0_31, %c0_32] : memref<1x16xf32, #tpu.memory_space<vmem>>, vector<1x16xf32>
    %88 = arith.truncf %85 : vector<16x64xf32> to vector<16x64xbf16>
    %cst_33 = arith.constant dense<0.000000e+00> : vector<16x16xf32>
    %89 = tpu.matmul %88, %86, %cst_33 {dimension_numbers = #tpu.dot_dimension_numbers<[1], [0], [0], [1], [0, 0, 1, 1], [], []>} : vector<16x64xbf16>, vector<64x16xbf16>, vector<16x16xf32> -> vector<16x16xf32>
    %90 = vector.broadcast %87 : vector<1x16xf32> to vector<16x16xf32>
    %91 = arith.addf %89, %90 : vector<16x16xf32>
    %c0_34 = arith.constant 0 : index
    %c0_35 = arith.constant 0 : index
    %92 = vector.load %arg9[%c0_34, %c0_35] : memref<16x16xf32, #tpu.memory_space<vmem>>, vector<16x16xf32>
    tpu.vector_store %arg9[%c0_34, %c0_35], %91 {strides = array<i32>} : memref<16x16xf32, #tpu.memory_space<vmem>>, vector<16x16xf32>,
    return
  }
  func.func @transform_0(%arg0: i32) -> (i32, i32) {
    %c0_i32 = arith.constant 0 : i32
    %c0_i32_0 = arith.constant 0 : i32
    return %arg0, %c0_i32 : i32, i32
  }
  func.func @transform_1(%arg0: i32) -> (i32, i32) {
    %c0_i32 = arith.constant 0 : i32
    %c0_i32_0 = arith.constant 0 : i32
    %c0_i32_1 = arith.constant 0 : i32
    return %c0_i32, %c0_i32_0 : i32, i32
  }
  func.func @transform_2(%arg0: i32) -> (i32, i32) {
    %c0_i32 = arith.constant 0 : i32
    %c0_i32_0 = arith.constant 0 : i32
    %c0_i32_1 = arith.constant 0 : i32
    return %c0_i32, %c0_i32_0 : i32, i32
  }
  func.func @transform_3(%arg0: i32) -> (i32, i32) {
    %c0_i32 = arith.constant 0 : i32
    %c0_i32_0 = arith.constant 0 : i32
    %c0_i32_1 = arith.constant 0 : i32
    return %c0_i32, %c0_i32_0 : i32, i32
  }
  func.func @transform_4(%arg0: i32) -> (i32, i32) {
    %c0_i32 = arith.constant 0 : i32
    %c0_i32_0 = arith.constant 0 : i32
    %c0_i32_1 = arith.constant 0 : i32
    return %c0_i32, %c0_i32_0 : i32, i32
  }
  func.func @transform_5(%arg0: i32) -> (i32, i32) {
    %c0_i32 = arith.constant 0 : i32
    %c0_i32_0 = arith.constant 0 : i32
    %c0_i32_1 = arith.constant 0 : i32
    return %c0_i32, %c0_i32_0 : i32, i32
  }
  func.func @transform_6(%arg0: i32) -> (i32, i32) {
    %c0_i32 = arith.constant 0 : i32
    %c0_i32_0 = arith.constant 0 : i32
    %c0_i32_1 = arith.constant 0 : i32
    return %c0_i32, %c0_i32_0 : i32, i32
  }
  func.func @transform_7(%arg0: i32) -> (i32, i32) {
    %c0_i32 = arith.constant 0 : i32
    %c0_i32_0 = arith.constant 0 : i32
    %c0_i32_1 = arith.constant 0 : i32
    return %c0_i32, %c0_i32_0 : i32, i32
  }
  func.func @transform_8(%arg0: i32) -> (i32, i32) {
    %c0_i32 = arith.constant 0 : i32
    %c0_i32_0 = arith.constant 0 : i32
    return %arg0, %c0_i32 : i32, i32
  }
}

</mosaic_0001>

<bundles_post_ra>
// kernel: _forward_impl.1
= control target key start
LH: loop header
LB: loop body
LE: loop exit
PB: predicated region body
PF: predicated region fallthrough
CT: control target
= control target key end

     0   :  { %13 = vsyncpa [#allocation3], 0  ;;  %s1172_s0 = inlined_call_operand.vmem [shape: f32[30,32], index: 0, kind: input, shape index: {}]   ;;  %s1173_s1 = inlined_call_operand.hbm [shape: f32[2,32], index: 1, kind: input, shape index: {}]   ;;  %s1174_s2 = inlined_call_operand.hbm [shape: bf16[32,64], index: 2, kind: input, shape index: {}]   ;;  %s1175_s3 = inlined_call_operand.vmem [shape: f32[3,64], index: 3, kind: input, shape index: {}]   ;;  %s1176_s4 = inlined_call_operand.hbm [shape: bf16[64,64], index: 4, kind: input, shape index: {}]   ;;  %s1177_s5 = inlined_call_operand.vmem [shape: f32[3,64], index: 5, kind: input, shape index: {}]   ;;  %s1178_s6 = inlined_call_operand.vmem [shape: bf16[64,16], index: 6, kind: input, shape index: {}]   ;;  %s1179_s7 = inlined_call_operand.vmem [shape: f32[1,16], index: 7, kind: input, shape index: {}]   ;;  %s1180_s8 = inlined_call_operand.vmem [shape: f32[30,16], index: 8, kind: output, shape index: {}]  }
   0x1   :  { %14 = vsyncpa [#allocation5], 0  ;;  %s1051_s27 = smov 0  }
   0x2 LB: > { %s247_s30 = sshll.u32 %s1174_s2, 4  ;;  %s763_s9 = sadd.s32 4294967295, %s997_s27   ;;  %s997_s27 = sphi %s1051_s27, %s20_s27   ;;  %s248_s30 = int_to_ptr.hbm [resolvable:$true] %s247_s30 }
   0x3   : > { %p765_p0 = scmp.ge.s32.totalorder %s997_s27, 1  ;;  %p224_p1 = scmp.lt.s32.totalorder %s997_s27, 3 }
   0x4   : > { %p1062_p2 = scmp.eq.s32.totalorder %s763_s9, 0  ;;  %s999_s12 = smov [#allocation4]  }
   0x5   : > { %p1066_p3 = pnand %p765_p0, %p224_p1  ;;  %s249_s13 = sshll.u32 %s999_s12, 4  ;;  %s250_s13 = int_to_ptr.vmem [resolvable:$true] %s249_s13 }
   0x6   : > { %s236_s16 = sshll.u32 %s1173_s1, 4  ;;  %s1000_s18 = smov [#allocation2]   ;;  %s237_s16 = int_to_ptr.hbm [resolvable:$true] %s236_s16 }
   0x7   : > { %p845_p4 = pneg %p1066_p3  ;;  %s238_s19 = sshll.u32 %s1000_s18, 4  ;;  %s239_s19 = int_to_ptr.vmem [resolvable:$true] %s238_s19 }
   0x8   : > { %s264_s22 = sshll.u32 %s1176_s4, 4  ;;  %s1001_s23 = smov 64   ;;  %s265_s22 = int_to_ptr.hbm [resolvable:$true] %s264_s22 }
   0x9   : > { %p1077_p5 = pnand %p1062_p2, %p845_p4  ;;  %s1002_s24 = smov 4  }
   0xa   : > { %s1003_s25 = smov [#allocation6]   ;;  %300 = sbr.rel (%p1066_p3) target bundleno = 1262 (0x4ee), region = 52 }
   0xb   : > { %851 = dma.hbm_to_vmem [thread:$0]  (!%p1077_p5), %s248_s30, 256, %s250_s13, [#allocation5], %s1001_s23, %s1001_s23, %s1002_s24  }
   0xc   : > { %848 = dma.hbm_to_vmem [thread:$0]  (!%p1077_p5), %s237_s16, 32, %s239_s19, [#allocation3]  }
   0xd   : > { %s266_s26 = sshll.u32 %s1003_s25, 4  ;;  %s267_s26 = int_to_ptr.vmem [resolvable:$true] %s266_s26 }
   0xe   : > { %854 = dma.hbm_to_vmem [thread:$0]  (!%p1077_p5), %s265_s22, 512, %s267_s26, [#allocation5], %s1001_s23, %s1001_s23, %s1002_s24  }
   0xf   : > { %988 = dma.done.wait (%p1062_p2), [#allocation3], 32  }
  0x10   : > { %990 = vsyncadd (%p1062_p2), [#allocation3], 4294967264 }
  0x11   : > { %992 = dma.done.wait (%p1062_p2), [#allocation5], 768  }
  0x12   : > { %994 = vsyncadd (%p1062_p2), [#allocation5], 4294966528  ;;  %s774_s28 = sshll.u32 %s763_s9, 1  ;;  %vm361_vm0 = vcmask 261120   ;;  %v1004_v4 = vmov 32.0   ;;  %v824_v21 = vld [vmem:[#allocation4 + $0x8] sm:$0xff] }
  0x13   : > { %p346_p6 = scmp.lt.s32.totalorder %s774_s28, 3  ;;  %877 = vrcp.f32 %v1004_v4  ;;  %447 = vmatpush.bf16.msra.mxu0 %v824_v21  ;;  %v823_v23 = vld [vmem:[#allocation4] sm:$0xff]  ;;  %v360_v40 = vld [vmem:[#allocation2] sm:$0x3]  ;;  %vm455_vm8 = vcmask 523264   ;;  %v1005_v61 = vmov 64.0  }
  0x14   : > { %v413_v43 = vperm.slane %v360_v40, 0  ;;  %v416_v48 = vperm.slane %v360_v40, 1  ;;  %v1116_v53 = vld [vmem:[%s1175_s3] sm:$0x7] }
  0x15   : > { %s1185_s28 = smov (!%p346_p6, %s774_s28), 3  ;;  %v425_v54 = vperm.slane %v1116_v53, 0 }
  0x16   : > { %s775_s29 = sshll.u32 %s1185_s28, 3 }
  0x17   : > { %s349_s12 = scalar_lea.vmem %s1172_s0, %s775_s29  ;;  %448 = vmatpush.bf16.msra.mxu0 %v823_v23  ;;  %s355_s30 = scalar_lea.vmem %s1180_s8, %s775_s29 }
  0x18   : > { %v358_v0 = vld [vmem:[%s349_s12] sm:$0xff]  ;;  %v359_v2 = vld [vmem:[%s349_s12 + $0x8] sm:$0xff] }
  0x19   : > { %v362_v1 = vsel %vm361_vm0, %v358_v0, 0.0  ;;  %v365_v3 = vsel %vm361_vm0, %v359_v2, 0.0  ;;  %v878_v5 = vpop.eup %877 }
  0x1a   : > { %363 = vadd.xlane.f32.xlu0 %v362_v1  ;;  %v369_v6 = vmul.f32 32.0, %v878_v5  ;;  %vm373_vm1 = vweird.f32 %v878_v5 }
  0x1c   : > { %v370_v7 = vsub.f32 1.0, %v369_v6 }
  0x1e   : > { %v371_v8 = vmul.f32 %v878_v5, %v370_v7 }
  0x20   : > { %v372_v9 = vadd.f32 %v878_v5, %v371_v8 }
  0x22   : > { %366 = vadd.xlane.f32.xlu0 %v365_v3  ;;  %v374_v10 = vsel %vm373_vm1, %v878_v5, %v372_v9 }
  0x8d   : > { %v364_v11 = vpop.xlane.xlu0 %363 }
  0x8e   : > { %v375_v12 = vmul.f32 %v374_v10, %v364_v11 }
  0x90   : > { %v377_v13 = vsub.f32 %v358_v0, %v375_v12 }
  0x92   : > { %v379_v14 = vmul.f32 %v377_v13, %v377_v13 }
  0x94   : > { %v381_v15 = vsel %vm361_vm0, %v379_v14, 0.0  ;;  %v828_v14 = vld [vmem:[#allocation6 + $0x18] sm:$0xff] }
  0x95   : > { %382 = vadd.xlane.f32.xlu1 %v381_v15  ;;  %v367_v16 = vpop.xlane.xlu0 %366  ;;  %557 = vmatpush.bf16.msra.mxu1 %v828_v14  ;;  %v827_v15 = vld [vmem:[#allocation6 + $0x10] sm:$0xff] }
  0x96   : > { %v376_v17 = vmul.f32 %v374_v10, %v367_v16  ;;  %v826_v16 = vld [vmem:[#allocation6 + $0x8] sm:$0xff] }
  0x98   : > { %v378_v18 = vsub.f32 %v359_v2, %v376_v17 }
  0x99   : > { %558 = vmatpush.bf16.msra.mxu1 %v827_v15 }
  0x9a   : > { %v380_v19 = vmul.f32 %v378_v18, %v378_v18 }
  0x9c   : > { %v384_v20 = vsel %vm361_vm0, %v380_v19, 0.0  ;;  %v825_v19 = vld [vmem:[#allocation6] sm:$0xff] }
  0x9d   : > { %385 = vadd.xlane.f32.xlu1 %v384_v20  ;;  %559 = vmatpush.bf16.msra.mxu1 %v826_v16 }
  0xa1   : > { %560 = vmatpush.bf16.msra.mxu1 %v825_v19 }
 0x108   : > { %v383_v22 = vpop.xlane.xlu1 %382 }
 0x109   : > { %v387_v24 = vmul.f32 %v383_v22, %v374_v10 }
 0x10b   : > { %v389_v25 = vadd.f32 1e-05, %v387_v24 }
 0x10d   : > { %879 = vrsqrt.f32 %v389_v25  ;;  %vm397_vm3 = vweird.f32 %v389_v25 }
 0x110   : > { %v386_v26 = vpop.xlane.xlu1 %385 }
 0x111   : > { %v388_v27 = vmul.f32 %v386_v26, %v374_v10 }
 0x113   : > { %v880_v28 = vpop.eup %879  ;;  %v390_v29 = vadd.f32 1e-05, %v388_v27 }
 0x114   : > { %v392_v30 = vmul.f32 %v880_v28, %v389_v25  ;;  %vm398_vm2 = vweird.f32 %v880_v28 }
 0x115   : > { %881 = vrsqrt.f32 %v390_v29  ;;  %vm399_vm4 = vmor %vm397_vm3, %vm398_vm2  ;;  %vm407_vm6 = vweird.f32 %v390_v29 }
 0x116   : > { %v393_v31 = vmul.f32 %v880_v28, %v392_v30  ;;  %883 = vrcp.f32 %v1005_v61 }
 0x118   : > { %v394_v32 = vmul.f32 0.5, %v393_v31 }
 0x11a   : > { %v395_v33 = vsub.f32 1.5, %v394_v32 }
 0x11b   : > { %v882_v34 = vpop.eup %881 }
 0x11c   : > { %v396_v35 = vmul.f32 %v880_v28, %v395_v33  ;;  %v402_v36 = vmul.f32 %v882_v34, %v390_v29  ;;  %vm408_vm5 = vweird.f32 %v882_v34  ;;  %v884_v62 = vpop.eup %883 }
 0x11d   : > { %vm409_vm7 = vmor %vm407_vm6, %vm408_vm5  ;;  %v463_v63 = vmul.f32 64.0, %v884_v62  ;;  %vm467_vm9 = vweird.f32 %v884_v62  ;;  %vm673_vm6 = vcmask 130048  }
 0x11e   : > { %v403_v37 = vmul.f32 %v882_v34, %v402_v36  ;;  %v400_v38 = vsel %vm399_vm4, %v880_v28, %v396_v35  ;;  %v507_v35 = vperm.slane %v1116_v53, 1 }
 0x11f   : > { %v411_v42 = vmul.f32 %v400_v38, %v377_v13  ;;  %v464_v0 = vsub.f32 1.0, %v463_v63 }
 0x120   : > { %v404_v39 = vmul.f32 0.5, %v403_v37 }
 0x121   : > { %v414_v47 = vmul.f32 %v413_v43, %v411_v42  ;;  %v465_v1 = vmul.f32 %v884_v62, %v464_v0 }
 0x122   : > { %v405_v41 = vsub.f32 1.5, %v404_v39  ;;  %v510_v39 = vperm.slane %v1116_v53, 2 }
 0x123   : > { %v417_v50 = vadd.f32 %v416_v48, %v414_v47  ;;  %v466_v2 = vadd.f32 %v884_v62, %v465_v1 }
 0x124   : > { %v406_v44 = vmul.f32 %v882_v34, %v405_v41 }
 0x125   : > { %v1121_v3 = vsel %vm467_vm9, %v884_v62, %v466_v2 }
 0x126   : > { %v410_v45 = vsel %vm409_vm7, %v882_v34, %v406_v44 }
 0x127   : > { %v412_v46 = vmul.f32 %v410_v45, %v378_v18 }
 0x129   : > { %v415_v49 = vmul.f32 %v413_v43, %v412_v46 }
 0x12b   : > { %v418_v51 = vadd.f32 %v416_v48, %v415_v49  ;;  %v1135_v49 = vld [vmem:[%s1177_s5] sm:$0x7] }
 0x12d   : > { %v424_v52 = vpack.c.bf16 %v418_v51, %v417_v50  ;;  %v525_v50 = vperm.slane %v1135_v49, 0 }
 0x12f   : > { %786 = vmatmul.msk.bf16.vlgmr.msra.gmra.mxu0 %vm361_vm0, %v424_v52 }
 0x1ac   : > { %v450_v55 = vpop.f32.mrf.mxu0 }
 0x1ad   : > { %v451_v56 = vadd.f32 %v450_v55, %v425_v54 }
 0x1af   : > { %v456_v57 = vsel %vm455_vm8, %v451_v56, 0.0 }
 0x1b0   : > { %457 = vadd.xlane.f32.xlu2 %v456_v57 }
 0x1b4   : > { %v452_v58 = vpop.f32.mrf.mxu0 }
 0x1b5   : > { %v453_v59 = vadd.f32 %v452_v58, %v425_v54 }
 0x1b7   : > { %v459_v60 = vsel %vm455_vm8, %v453_v59, 0.0 }
 0x1b8   : > { %460 = vadd.xlane.f32.xlu2 %v459_v60 }
 0x223   : > { %v458_v4 = vpop.xlane.xlu2 %457 }
 0x224   : > { %v469_v5 = vmul.f32 %v1121_v3, %v458_v4  ;;  %v832_v4 = vld [vmem:[%s1178_s6 + $0x18] sm:$0xff] }
 0x225   : > { %663 = vmatpush.bf16.msra.mxu2 %v832_v4 }
 0x226   : > { %v471_v6 = vsub.f32 %v451_v56, %v469_v5  ;;  %v831_v5 = vld [vmem:[%s1178_s6 + $0x10] sm:$0xff] }
 0x228   : > { %v473_v7 = vmul.f32 %v471_v6, %v471_v6 }
 0x229   : > { %664 = vmatpush.bf16.msra.mxu2 %v831_v5 }
 0x22a   : > { %v475_v8 = vsel %vm455_vm8, %v473_v7, 0.0 }
 0x22b   : > { %476 = vadd.xlane.f32.xlu0 %v475_v8  ;;  %v461_v9 = vpop.xlane.xlu2 %460 }
 0x22c   : > { %v470_v10 = vmul.f32 %v1121_v3, %v461_v9  ;;  %v829_v9 = vld [vmem:[%s1178_s6] sm:$0xff] }
 0x22e   : > { %v472_v11 = vsub.f32 %v453_v59, %v470_v10 }
 0x230   : > { %v474_v12 = vmul.f32 %v472_v11, %v472_v11 }
 0x232   : > { %v478_v13 = vsel %vm455_vm8, %v474_v12, 0.0 }
 0x233   : > { %479 = vadd.xlane.f32.xlu1 %v478_v13 }
 0x29e   : > { %v477_v17 = vpop.xlane.xlu0 %476 }
 0x29f   : > { %v481_v18 = vmul.f32 %v477_v17, %v1121_v3 }
 0x2a1   : > { %v483_v20 = vadd.f32 1e-05, %v481_v18 }
 0x2a3   : > { %885 = vrsqrt.f32 %v483_v20  ;;  %vm491_vm11 = vweird.f32 %v483_v20 }
 0x2a6   : > { %v480_v21 = vpop.xlane.xlu1 %479 }
 0x2a7   : > { %v482_v22 = vmul.f32 %v480_v21, %v1121_v3 }
 0x2a9   : > { %v886_v23 = vpop.eup %885  ;;  %v484_v24 = vadd.f32 1e-05, %v482_v22 }
 0x2aa   : > { %v486_v25 = vmul.f32 %v886_v23, %v483_v20  ;;  %vm492_vm10 = vweird.f32 %v886_v23 }
 0x2ab   : > { %887 = vrsqrt.f32 %v484_v24  ;;  %vm493_vm12 = vmor %vm491_vm11, %vm492_vm10  ;;  %vm501_vm14 = vweird.f32 %v484_v24 }
 0x2ac   : > { %v487_v26 = vmul.f32 %v886_v23, %v486_v25  ;;  %v611_v25 = vperm.slane %v1135_v49, 1 }
 0x2ae   : > { %v488_v27 = vmul.f32 0.5, %v487_v26 }
 0x2b0   : > { %v489_v28 = vsub.f32 1.5, %v488_v27 }
 0x2b1   : > { %v888_v29 = vpop.eup %887 }
 0x2b2   : > { %v490_v30 = vmul.f32 %v886_v23, %v489_v28  ;;  %v496_v31 = vmul.f32 %v888_v29, %v484_v24  ;;  %vm502_vm13 = vweird.f32 %v888_v29  ;;  %v614_v28 = vperm.slane %v1135_v49, 2 }
 0x2b3   : > { %vm503_vm15 = vmor %vm501_vm14, %vm502_vm13 }
 0x2b4   : > { %v494_v32 = vsel %vm493_vm12, %v886_v23, %v490_v30  ;;  %v497_v33 = vmul.f32 %v888_v29, %v496_v31 }
 0x2b5   : > { %v505_v36 = vmul.f32 %v494_v32, %v471_v6  ;;  %v830_v6 = vld [vmem:[%s1178_s6 + $0x8] sm:$0xff] }
 0x2b6   : > { %v498_v34 = vmul.f32 0.5, %v497_v33  ;;  %665 = vmatpush.bf16.msra.mxu2 %v830_v6 }
 0x2b7   : > { %v508_v40 = vmul.f32 %v507_v35, %v505_v36 }
 0x2b8   : > { %v499_v37 = vsub.f32 1.5, %v498_v34 }
 0x2b9   : > { %v511_v44 = vadd.f32 %v510_v39, %v508_v40 }
 0x2ba   : > { %v500_v38 = vmul.f32 %v888_v29, %v499_v37  ;;  %666 = vmatpush.bf16.msra.mxu2 %v829_v9 }
 0x2bb   : > { %v513_v46 = vmax.f32 %v511_v44, 0.0 }
 0x2bc   : > { %v504_v41 = vsel %vm503_vm15, %v888_v29, %v500_v38  ;;  %v876_v38 = vld [vmem:[%s1179_s7] ss:$0 sm:$0xff] }
 0x2bd   : > { %v506_v42 = vmul.f32 %v504_v41, %v472_v11 }
 0x2bf   : > { %v509_v43 = vmul.f32 %v507_v35, %v506_v42 }
 0x2c1   : > { %v512_v45 = vadd.f32 %v510_v39, %v509_v43 }
 0x2c3   : > { %v514_v47 = vmax.f32 %v512_v45, 0.0 }
 0x2c5   : > { %v524_v48 = vpack.c.bf16 %v514_v47, %v513_v46 }
 0x2c7   : > { %803 = vmatmul.msk.bf16.vlgmr.msra.gmra.mxu1 %vm455_vm8, %v524_v48 }
 0x344   : > { %v562_v51 = vpop.f32.mrf.mxu1 }
 0x345   : > { %v563_v52 = vadd.f32 %v562_v51, %v525_v50 }
 0x347   : > { %v567_v53 = vsel %vm455_vm8, %v563_v52, 0.0 }
 0x348   : > { %568 = vadd.xlane.f32.xlu2 %v567_v53 }
 0x34c   : > { %v564_v54 = vpop.f32.mrf.mxu1 }
 0x34d   : > { %v565_v55 = vadd.f32 %v564_v54, %v525_v50 }
 0x34f   : > { %v570_v56 = vsel %vm455_vm8, %v565_v55, 0.0 }
 0x350   : > { %571 = vadd.xlane.f32.xlu0 %v570_v56 }
 0x3bb   : > { %v569_v57 = vpop.xlane.xlu2 %568 }
 0x3bc   : > { %v573_v58 = vmul.f32 %v569_v57, %v1121_v3 }
 0x3be   : > { %v575_v59 = vsub.f32 %v563_v52, %v573_v58 }
 0x3c0   : > { %v577_v60 = vmul.f32 %v575_v59, %v575_v59 }
 0x3c2   : > { %v579_v61 = vsel %vm455_vm8, %v577_v60, 0.0 }
 0x3c3   : > { %v572_v62 = vpop.xlane.xlu0 %571  ;;  %580 = vadd.xlane.f32.xlu1 %v579_v61 }
 0x3c4   : > { %v574_v63 = vmul.f32 %v572_v62, %v1121_v3 }
 0x3c6   : > { %v576_v0 = vsub.f32 %v565_v55, %v574_v63 }
 0x3c8   : > { %v578_v1 = vmul.f32 %v576_v0, %v576_v0 }
 0x3ca   : > { %v582_v2 = vsel %vm455_vm8, %v578_v1, 0.0 }
 0x3cb   : > { %583 = vadd.xlane.f32.xlu2 %v582_v2 }
 0x436   : > { %v581_v7 = vpop.xlane.xlu1 %580 }
 0x437   : > { %v585_v8 = vmul.f32 %v581_v7, %v1121_v3 }
 0x439   : > { %v587_v10 = vadd.f32 1e-05, %v585_v8 }
 0x43b   : > { %889 = vrsqrt.f32 %v587_v10  ;;  %vm595_vm1 = vweird.f32 %v587_v10 }
 0x43e   : > { %v584_v11 = vpop.xlane.xlu2 %583 }
 0x43f   : > { %v586_v12 = vmul.f32 %v584_v11, %v1121_v3 }
 0x441   : > { %v890_v13 = vpop.eup %889  ;;  %v588_v14 = vadd.f32 1e-05, %v586_v12 }
 0x442   : > { %v590_v15 = vmul.f32 %v890_v13, %v587_v10  ;;  %vm596_vm0 = vweird.f32 %v890_v13 }
 0x443   : > { %891 = vrsqrt.f32 %v588_v14  ;;  %vm597_vm2 = vmor %vm595_vm1, %vm596_vm0  ;;  %vm605_vm4 = vweird.f32 %v588_v14 }
 0x444   : > { %v591_v16 = vmul.f32 %v890_v13, %v590_v15 }
 0x446   : > { %v592_v17 = vmul.f32 0.5, %v591_v16 }
 0x448   : > { %v593_v18 = vsub.f32 1.5, %v592_v17 }
 0x449   : > { %v892_v19 = vpop.eup %891 }
 0x44a   : > { %v594_v20 = vmul.f32 %v890_v13, %v593_v18  ;;  %v600_v21 = vmul.f32 %v892_v19, %v588_v14  ;;  %vm606_vm3 = vweird.f32 %v892_v19 }
 0x44b   : > { %vm607_vm5 = vmor %vm605_vm4, %vm606_vm3 }
 0x44c   : > { %v598_v22 = vsel %vm597_vm2, %v890_v13, %v594_v20  ;;  %v601_v23 = vmul.f32 %v892_v19, %v600_v21 }
 0x44d   : > { %v609_v26 = vmul.f32 %v598_v22, %v575_v59 }
 0x44e   : > { %v602_v24 = vmul.f32 0.5, %v601_v23 }
 0x44f   : > { %v612_v29 = vmul.f32 %v611_v25, %v609_v26 }
 0x450   : > { %v603_v3 = vsub.f32 1.5, %v602_v24 }
 0x451   : > { %v615_v33 = vadd.f32 %v614_v28, %v612_v29 }
 0x452   : > { %v604_v27 = vmul.f32 %v892_v19, %v603_v3 }
 0x453   : > { %v617_v35 = vmax.f32 %v615_v33, 0.0 }
 0x454   : > { %v608_v30 = vsel %vm607_vm5, %v892_v19, %v604_v27 }
 0x455   : > { %v610_v31 = vmul.f32 %v608_v30, %v576_v0 }
 0x457   : > { %v613_v32 = vmul.f32 %v611_v25, %v610_v31 }
 0x459   : > { %v616_v34 = vadd.f32 %v614_v28, %v613_v32 }
 0x45b   : > { %v618_v36 = vmax.f32 %v616_v34, 0.0 }
 0x45d   : > { %v628_v37 = vpack.c.bf16 %v618_v36, %v617_v35 }
 0x45f   : > { %820 = vmatmul.msk.bf16.vlgmr.msra.gmra.mxu2 %vm455_vm8, %v628_v37 }
 0x4e2   : > { %v668_v39 = vpop.f32.mrf.mxu2 }
 0x4e3   : > { %v669_v40 = vadd.f32 %v876_v38, %v668_v39 }
 0x4e5   : > { %674 = vst.msk [vmem:[%s355_s30] sm:$0xff] %vm673_vm6, %v669_v40 }
 0x4ea   : > { %v670_v41 = vpop.f32.mrf.mxu2 }
 0x4eb   : > { %v671_v42 = vadd.f32 %v876_v38, %v670_v41 }
 0x4ed   : > { %675 = vst.msk [vmem:[%s355_s30 + $0x8] sm:$0xff] %vm673_vm6, %v671_v42 }
 0x4ee PF: > { %s20_s27 = sadd.s32 1, %s997_s27  }
 0x4ef   : > { %p17_p7 = scmp.ge.s32.totalorder %s20_s27, 4  }
 0x4f1   :  { %19 = sbr.rel (!%p17_p7) target bundleno = 2 (0x2), region = 95 }
 0x4f6   :  { %698 = vsyncpa [#allocation3], 1 }
 0x4f7   :  { %700 = vsyncpa [#allocation3 + $0x1], 1 }
 0x4f8   :  { %701 = vsyncpa [#allocation5], 1 }

</bundles_post_ra>
